<compile_context>
chip_gen: v7x
topology: tpu7x:2x2x1
jax: 0.10.0
libtpu: 0.0.40
codegen_flags: <defaults>
</compile_context>

<pallas_src>
from dataclasses import dataclass
from typing import Dict, List, Optional

import jax
import jax.numpy as jnp
from jax.experimental import pallas as pl
from jax.experimental.pallas import tpu as pltpu


# ----------------------------- metadata glue ------------------------------- #

@dataclass
class ShapeSpec:
    channels: int
    stride: int


class Backbone:
    """JAX/Pallas port of the abstract Backbone base class."""

    def __init__(self):
        self._out_features: List[str] = []
        self._out_feature_channels: Dict[str, int] = {}
        self._out_feature_strides: Dict[str, int] = {}

    @property
    def size_divisibility(self) -> int:
        return 0

    def output_shape(self) -> Dict[str, ShapeSpec]:
        return {
            name: ShapeSpec(
                channels=self._out_feature_channels[name],
                stride=self._out_feature_strides[name],
            )
            for name in self._out_features
        }

    # Base-class forward is abstract; the only tensor contract it exposes is
    # "feature map in -> feature map out". `use_kernel=False` is the zero-cost
    # path (return x, no HBM traffic); `use_kernel=True` routes through the
    # lane-dense Pallas identity kernel that subclasses would fuse compute into.
    def forward(self, x: jax.Array, *, use_kernel: bool = True) -> jax.Array:
        if not use_kernel:
            return x
        return backbone_passthrough(x)

    __call__ = forward


# ------------------------------ Pallas kernel ------------------------------ #

_LANE = 128     # vreg lane width
_SUBLANE = 8    # vreg sublane count (32-bit)


def _copy_kernel(x_ref, o_ref):
    # One lane-dense (tile_rows, lane) slab: full-width unmasked stores.
    o_ref[...] = x_ref[...]


def _default_block_byte_budget() -> int:
    """Per-block byte budget, per chip generation.

    Peak VMEM ~= 4 * budget (1 input + 1 output, each double-buffered):
      v5e: 3 MiB -> ~12 MiB peak (16 MiB default scoped VMEM)
      v6e: 4 MiB -> ~16 MiB peak (32 MiB default scoped VMEM)
      v7x: 6 MiB -> ~24 MiB peak (32 MiB default scoped, 64 MiB physical)
    """
    try:
        kind = jax.devices()[0].device_kind.lower()
    except Exception:  # pragma: no cover - defensive
        kind = ""
    if "v5" in kind:
        return 3 * 1024 * 1024
    if "v7" in kind:
        return 6 * 1024 * 1024
    return 4 * 1024 * 1024


def _pick_lane(total: int) -> int:
    """Co-select lane width: prefer lanes that keep rows a multiple of 8.

    Lane=128 is already fully lane-dense (unmasked vst); widths beyond ~512
    buy nothing, so we only look at {512, 256, 128} and pick the first that
    divides `total` while keeping rows sublane-aligned (>= 8 and % 8 == 0).
    """
    for lane in (512, 256, 128):
        if total % lane:
            continue
        rows = total // lane
        if rows >= _SUBLANE and rows % _SUBLANE == 0:
            return lane
    for lane in (512, 256, 128):
        if total % lane == 0 and total // lane >= _SUBLANE:
            return lane
    return _LANE


def _select_tile_rows(rows: int, lane: int, itemsize: int, budget: int) -> int:
    """Row tile: sublane multiple, fits the byte budget, even #steps if easy."""
    if rows <= _SUBLANE:
        return rows  # full-extent block along the sublane axis
    max_rows = max(_SUBLANE, (budget // (lane * itemsize)) // _SUBLANE * _SUBLANE)
    tile = min(max_rows, (rows // _SUBLANE) * _SUBLANE)
    tile = max(tile, _SUBLANE)
    steps = pl.cdiv(rows, tile)
    # Prefer an even step count so the "parallel" grid axis splits evenly
    # across v7x's two TensorCores (no-op on single-TC v5e/v6e).
    if steps > 1 and steps % 2 == 1:
        steps += 1
        even_tile = pl.cdiv(pl.cdiv(rows, steps), _SUBLANE) * _SUBLANE
        tile = max(_SUBLANE, min(tile, even_tile))
    return tile


def _tiled_copy(flat2d: jax.Array, budget: int) -> jax.Array:
    rows, lane = flat2d.shape
    itemsize = jnp.dtype(flat2d.dtype).itemsize
    tile_rows = _select_tile_rows(rows, lane, itemsize, budget)
    steps = pl.cdiv(rows, tile_rows)  # ragged last block handled by Pallas
    return pl.pallas_call(
        _copy_kernel,
        out_shape=jax.ShapeDtypeStruct((rows, lane), flat2d.dtype),
        grid=(steps,),
        in_specs=[pl.BlockSpec((tile_rows, lane), lambda i: (i, 0))],
        out_specs=pl.BlockSpec((tile_rows, lane), lambda i: (i, 0)),
        # Buffer donation only: HBM read/write traffic is unchanged; if the
        # caller keeps the input alive, XLA inserts a copy and this is a no-op.
        input_output_aliases={0: 0},
        compiler_params=pltpu.CompilerParams(
            dimension_semantics=("parallel",),
        ),
        cost_estimate=pl.CostEstimate(
            flops=0,
            transcendentals=0,
            bytes_accessed=2 * rows * lane * itemsize,
        ),
    )(flat2d)


def backbone_passthrough(
    x: jax.Array, *, block_byte_budget: Optional[int] = None
) -> jax.Array:
    """Pallas pass-through: flatten to a lane-dense 2-D slab and copy."""
    orig_shape = x.shape
    total = int(x.size)
    if total == 0:
        return x
    budget = block_byte_budget or _default_block_byte_budget()

    if total % _LANE == 0:
        lane = _pick_lane(total)
        flat = x.reshape(total // lane, lane)
        out = _tiled_copy(flat, budget)
        return out.reshape(orig_shape)

    # Element count not a multiple of 128: pad to a whole number of (8,128)
    # tiles in the wrapper, run the same tiled path, then slice back. This
    # keeps full sublane occupancy and bounded VMEM (no giant (1, total) block).
    tile_elems = _SUBLANE * _LANE
    padded_total = pl.cdiv(total, tile_elems) * tile_elems
    flat = jnp.pad(x.reshape(-1), (0, padded_total - total))
    flat = flat.reshape(padded_total // _LANE, _LANE)
    out = _tiled_copy(flat, budget)
    return out.reshape(-1)[:total].reshape(orig_shape)


# ---------------------------------- main ----------------------------------- #

if __name__ == "__main__":
    key = jax.random.PRNGKey(0)
    # Small NCHW input consistent with a detection backbone's image tensor.
    x = jax.random.normal(key, (2, 4, 16, 16), dtype=jnp.float32)

    backbone = Backbone()
    # The base class carries no learned parameters; populate its metadata
    # deterministically the way a subclass __init__ would.
    backbone._out_features = ["res2"]
    backbone._out_feature_channels = {"res2": 4}
    backbone._out_feature_strides = {"res2": 1}

    out = jax.block_until_ready(backbone(x))
    assert out.shape == x.shape and out.dtype == x.dtype
    assert bool(jnp.allclose(out, x))
    assert backbone.size_divisibility == 0
    spec = backbone.output_shape()["res2"]
    assert spec.channels == 4 and spec.stride == 1

    # Zero-cost base-class contract path (no kernel launch).
    out_fast = backbone(x, use_kernel=False)
    assert out_fast is x

    # Exercise the multi-block (grid > 1) path with a tiny per-block budget.
    x2 = jax.random.normal(jax.random.PRNGKey(0), (2, 4, 32, 128), jnp.float32)
    out2 = jax.block_until_ready(
        backbone_passthrough(x2, block_byte_budget=16 * 1024)
    )
    assert out2.shape == x2.shape and bool(jnp.allclose(out2, x2))

    # Exercise the ragged-last-block path (rows not a multiple of the tile).
    x3 = jax.random.normal(jax.random.PRNGKey(0), (1, 1, 9, 128), jnp.float32)
    out3 = jax.block_until_ready(backbone_passthrough(x3))
    assert out3.shape == x3.shape and bool(jnp.allclose(out3, x3))

    # Exercise the pad-and-slice fallback (element count not divisible by 128).
    x4 = jax.random.normal(jax.random.PRNGKey(0), (3, 5, 7, 11), jnp.float32)
    out4 = jax.block_until_ready(backbone_passthrough(x4))
    assert out4.shape == x4.shape and bool(jnp.allclose(out4, x4))

    print("KERNEL_OK")
</pallas_src>

<mosaic_0001>
module attributes {stable_mosaic.version = 11 : i64} {
  func.func @_copy_kernel(%arg0: i32, %arg1: memref<8x256xf32, #tpu.memory_space<vmem>>, %arg2: memref<8x256xf32, #tpu.memory_space<vmem>>) attributes {dimension_semantics = [#tpu.dimension_semantics<parallel>], iteration_bounds = array<i64: 1>, scalar_prefetch = 0 : i64, scratch_operands = 0 : i64, tpu.core_type = #tpu.core_type<tc>, window_params = [{transform_indices = @transform_0, window_bounds = array<i64: 8, 256>}, {transform_indices = @transform_1, window_bounds = array<i64: 8, 256>}]} {
    %c0 = arith.constant 0 : index
    %c0_0 = arith.constant 0 : index
    %0 = vector.load %arg1[%c0, %c0_0] : memref<8x256xf32, #tpu.memory_space<vmem>>, vector<8x256xf32>
    %c0_1 = arith.constant 0 : index
    %c0_2 = arith.constant 0 : index
    %1 = vector.load %arg2[%c0_1, %c0_2] : memref<8x256xf32, #tpu.memory_space<vmem>>, vector<8x256xf32>
    tpu.vector_store %arg2[%c0_1, %c0_2], %0 {strides = array<i32>} : memref<8x256xf32, #tpu.memory_space<vmem>>, vector<8x256xf32>,
    return
  }
  func.func @transform_0(%arg0: i32) -> (i32, i32) {
    %c0_i32 = arith.constant 0 : i32
    %c0_i32_0 = arith.constant 0 : i32
    return %arg0, %c0_i32 : i32, i32
  }
  func.func @transform_1(%arg0: i32) -> (i32, i32) {
    %c0_i32 = arith.constant 0 : i32
    %c0_i32_0 = arith.constant 0 : i32
    return %arg0, %c0_i32 : i32, i32
  }
}

</mosaic_0001>

<bundles_post_ra>
// kernel: tpu_custom_call.1
= control target key start
LH: loop header
LB: loop body
LE: loop exit
PB: predicated region body
PF: predicated region fallthrough
CT: control target
= control target key end

     0   :  { %6 = vsyncpa [#allocation3], 0  ;;  %s126_s0 = inlined_call_operand.hbm [shape: f32[8,256], index: 0, kind: input, shape index: {}, may-alias: {0,1}]   ;;  %s127_s1 = inlined_call_operand.hbm [shape: f32[8,256], index: 1, kind: output, shape index: {}, may-alias: {0,1}]  }
   0x1   :  { %7 = vsyncpa [#allocation4], 0  ;;  %s90_s6 = smov [#allocation2]   ;;  %s42_s10 = scalar_lea.hbm %s126_s0, 256 }
   0x2   :  { %s14_s7 = sshll.u32 %s90_s6, 4  ;;  %p43_p0 = scmp.ne.s32.totalorder %s126_s0, %s42_s10  ;;  %s15_s7 = int_to_ptr.vmem [resolvable:$true] %s14_s7 }
   0x3   :  { %p46_p1 = scmp.lt.u32.totalorder %s42_s10, %s126_s0 }
   0x5   :  { %p48_p2 = pnand %p46_p1, %p43_p0 }
   0x7   :  { %51 = shalt.err (!%p48_p2)
}
   0x8   :  { %s52_s15 = scalar_lea.vmem %s15_s7, 256  ;;  %p57_p4 = scmp.lt.s32.totalorder %s15_s7, %s15_s7 }
   0x9   :  { %p53_p3 = scmp.ne.s32.totalorder %s15_s7, %s52_s15  ;;  %p58_p5 = scmp.lt.s32.totalorder %s52_s15, %s52_s15 }
   0xb   :  { %p59_p6 = por %p58_p5, %p57_p4 }
   0xd   :  { %p60_p7 = pnand %p59_p6, %p53_p3 }
   0xf   :  { %63 = shalt.err (!%p60_p7)
}
  0x10   :  { %17 = dma.hbm_to_vmem [thread:$0]  %s126_s0, 256, %s15_s7, [#allocation3]  }
  0x11   :  { %86 = dma.done.wait [#allocation3], 256  }
  0x12   :  { %87 = vsyncadd [#allocation3], 4294967040  ;;  %s91_s18 = smov [#allocation5]   ;;  %v21_v0 = vld [vmem:[#allocation2] sm:$0xff]  ;;  %v22_v1 = vld [vmem:[#allocation2 + $0x8] sm:$0xff] }
  0x13   :  { %s31_s19 = sshll.u32 %s91_s18, 4  ;;  %23 = vst [vmem:[#allocation5] sm:$0xff] %v21_v0  ;;  %24 = vst [vmem:[#allocation5 + $0x8] sm:$0xff] %v22_v1  ;;  %s32_s19 = int_to_ptr.vmem [resolvable:$true] %s31_s19 }
  0x14   :  { %s64_s20 = scalar_lea.vmem %s32_s19, 256  ;;  %p69_p9 = scmp.lt.s32.totalorder %s32_s19, %s32_s19 }
  0x15   :  { %p65_p8 = scmp.ne.s32.totalorder %s32_s19, %s64_s20  ;;  %p70_p10 = scmp.lt.s32.totalorder %s64_s20, %s64_s20 }
  0x17   :  { %p71_p11 = por %p70_p10, %p69_p9 }
  0x19   :  { %p72_p12 = pnand %p71_p11, %p65_p8 }
  0x1b   :  { %75 = shalt.err (!%p72_p12)
}
  0x1c   :  { %s76_s0 = scalar_lea.hbm %s127_s1, 256 }
  0x1d   :  { %p77_p13 = scmp.ne.s32.totalorder %s127_s1, %s76_s0  ;;  %p80_p0 = scmp.lt.u32.totalorder %s76_s0, %s127_s1 }
  0x1f   :  { %p82_p1 = pnand %p80_p0, %p77_p13 }
  0x21   :  { %85 = shalt.err (!%p82_p1)
}
  0x22   :  { %34 = dma.vmem_to_hbm [thread:$0]  %s32_s19, 256, %s127_s1, [#allocation4]  }
  0x23   :  { %88 = dma.done.wait [#allocation4], 256  }
  0x24   :  { %89 = vsyncadd [#allocation4], 4294967040 }
  0x25   :  { %38 = vsyncpa [#allocation3], 1 }
  0x26   :  { %39 = vsyncpa [#allocation4], 1 }

</bundles_post_ra>
